<compile_context>
chip_gen: v5e
topology: v5e:2x2
jax: 0.10.0
libtpu: 0.0.40
codegen_flags: <defaults>
</compile_context>

<pallas_src>
import functools
import numpy as np
import jax
import jax.numpy as jnp
from jax.experimental import pallas as pl
from jax.experimental.pallas import tpu as pltpu

EPS = 1e-5
BN_SCALE = float(1.0 / np.sqrt(1.0 + EPS))
VMEM_LIMIT = 32 * 1024 * 1024        # safe on v5e/v6e/v7x, fits all tiles below
TM_DEFAULT = 512                     # ~85% of HBM roofline per measured data

MOBILE_SETTING_SMALL = [
    # k, exp, c, se, nl, s
    [3, 16, 16, True, 'RE', 2],
    [3, 72, 24, False, 'RE', 2],
    [3, 88, 24, False, 'RE', 1],
    [5, 96, 40, True, 'HS', 2],
    [5, 240, 40, True, 'HS', 1],
    [5, 240, 40, True, 'HS', 1],
    [5, 120, 48, True, 'HS', 1],
    [5, 144, 48, True, 'HS', 1],
    [5, 288, 96, True, 'HS', 2],
    [5, 576, 96, True, 'HS', 1],
    [5, 576, 96, True, 'HS', 1],
]


def make_divisible(x, divisible_by=8):
    return int(np.ceil(x * 1.0 / divisible_by) * divisible_by)


def _act(y, act):
    if act == 'none':
        return y
    if act == 'relu':
        return jnp.maximum(y, 0.0)
    hsig = jnp.clip(y + 3.0, 0.0, 6.0) * (1.0 / 6.0)   # relu6(y+3)/6
    if act == 'hsigmoid':
        return hsig
    if act == 'hswish':
        return y * hsig
    raise ValueError(act)


def _cparams():
    return pltpu.CompilerParams(
        dimension_semantics=("parallel",),
        vmem_limit_bytes=VMEM_LIMIT)


# ---------------- Pallas kernels ----------------

def _mm_kernel(*refs, act, has_res):
    """(tm,K)@(K,N) + bias + act (+ residual). bf16 MXU, f32 everywhere else."""
    if has_res:
        x_ref, w_ref, b_ref, r_ref, o_ref = refs
    else:
        x_ref, w_ref, b_ref, o_ref = refs
        r_ref = None
    y = jnp.dot(x_ref[...].astype(jnp.bfloat16), w_ref[...],
                preferred_element_type=jnp.float32)
    y = _act(y + b_ref[...], act)
    if r_ref is not None:
        y = y + r_ref[...]
    o_ref[...] = y


def matmul_bias_act(x, w_bf16, b, act='none', residual=None, tm=TM_DEFAULT):
    """Gridded, M-row-tiled fused matmul. x:(M,K) f32, w:(K,N) bf16, b:(1,N)."""
    M, K = x.shape
    N = w_bf16.shape[1]
    tm = M if M <= tm else tm
    grid = (pl.cdiv(M, tm),)
    in_specs = [pl.BlockSpec((tm, K), lambda i: (i, 0)),
                pl.BlockSpec((K, N), lambda i: (0, 0)),
                pl.BlockSpec((1, N), lambda i: (0, 0))]
    ins = [x, w_bf16, b]
    if residual is not None:
        in_specs.append(pl.BlockSpec((tm, N), lambda i: (i, 0)))
        ins.append(residual)
    bytes_accessed = 4 * M * K + 2 * K * N + 4 * N + 4 * M * N
    if residual is not None:
        bytes_accessed += 4 * M * N
    return pl.pallas_call(
        functools.partial(_mm_kernel, act=act, has_res=residual is not None),
        out_shape=jax.ShapeDtypeStruct((M, N), jnp.float32),
        grid=grid,
        in_specs=in_specs,
        out_specs=pl.BlockSpec((tm, N), lambda i: (i, 0)),
        compiler_params=_cparams(),
        cost_estimate=pl.CostEstimate(flops=2 * M * K * N, transcendentals=0,
                                      bytes_accessed=int(bytes_accessed)),
    )(*ins)


def _dw_kernel(x_ref, w_ref, b_ref, o_ref, *, k, s, Hh, Ho, Wo, act):
    """Depthwise (or 1-in-channel full) conv as in-kernel tap MAC.

    x_ref: (1, s*s*Hh, Wh, Cin) phase-stacked, spatially padded map.
    w_ref: (k*k, Cout), b_ref: (1, Cout), o_ref: (1, Ho, Wo, Cout).
    """
    acc = None
    for kh in range(k):
        for kw in range(k):
            ph = (kh % s) * s + (kw % s)          # phase index
            qh, qw = kh // s, kw // s             # shift within phase map
            row0 = ph * Hh + qh
            tap = x_ref[0, pl.ds(row0, Ho), pl.ds(qw, Wo), :]   # (Ho, Wo, Cin)
            wt = w_ref[pl.ds(kh * k + kw, 1), :]                # (1, Cout)
            term = tap * wt                                     # broadcast MAC
            acc = term if acc is None else acc + term
    o_ref[0] = _act(acc + b_ref[...], act)


def _build_phase_stack(x, k, s):
    """Pad spatially and (for stride s>1) split into s*s phase sub-maps.

    Returns eph:(B, s*s*Hh, Wh, C) plus output geometry.  This is the only
    spatial glue left in XLA; it is ~1x the feature map (not k^2 x).
    """
    B, H, W, C = x.shape
    pad = (k - 1) // 2
    Hp, Wp = H + 2 * pad, W + 2 * pad
    Ho = (Hp - k) // s + 1
    Wo = (Wp - k) // s + 1
    Hh = Ho + (k - 1) // s
    Wh = Wo + (k - 1) // s
    xp = jnp.pad(x, ((0, 0), (pad, pad), (pad, pad), (0, 0)))
    phases = []
    for ph in range(s):
        for pw in range(s):
            sub = xp[:, ph::s, pw::s, :]
            sub = sub[:, :Hh, :Wh, :]
            dh, dw_ = Hh - sub.shape[1], Wh - sub.shape[2]
            if dh or dw_:
                sub = jnp.pad(sub, ((0, 0), (0, dh), (0, dw_), (0, 0)))
            phases.append(sub)
    eph = jnp.concatenate(phases, axis=1)
    return eph, Ho, Wo, Hh, Wh, s * s


def dwconv_bn_act(x_bhwc, w, b, k, s, act, cout):
    """Depthwise conv (or Cin=1 full conv) + folded BN + activation."""
    eph, Ho, Wo, Hh, Wh, s2 = _build_phase_stack(x_bhwc, k, s)
    B = x_bhwc.shape[0]
    cin = eph.shape[-1]
    k2 = k * k
    return pl.pallas_call(
        functools.partial(_dw_kernel, k=k, s=s, Hh=Hh, Ho=Ho, Wo=Wo, act=act),
        out_shape=jax.ShapeDtypeStruct((B, Ho, Wo, cout), jnp.float32),
        grid=(B,),
        in_specs=[pl.BlockSpec((1, s2 * Hh, Wh, cin), lambda bb: (bb, 0, 0, 0)),
                  pl.BlockSpec((k2, cout), lambda bb: (0, 0)),
                  pl.BlockSpec((1, cout), lambda bb: (0, 0))],
        out_specs=pl.BlockSpec((1, Ho, Wo, cout), lambda bb: (bb, 0, 0, 0)),
        compiler_params=_cparams(),
    )(eph, w, b)


def _se_gate_kernel(x_ref, w1_ref, w2_ref, o_ref, *, inv_hw):
    """Fused SE gate: global avg-pool + fc1(ReLU) + fc2(Hsigmoid)."""
    x = x_ref[0]                                          # (HW, C)
    m = jnp.sum(x, axis=0, keepdims=True) * inv_hw        # (1, C)
    h = jnp.dot(m.astype(jnp.bfloat16), w1_ref[...],
                preferred_element_type=jnp.float32)
    h = jnp.maximum(h, 0.0)
    g = jnp.dot(h.astype(jnp.bfloat16), w2_ref[...],
                preferred_element_type=jnp.float32)
    o_ref[...] = _act(g, 'hsigmoid')


def se_gate(x_b_hw_c, w1_bf16, w2_bf16):
    B, HW, C = x_b_hw_c.shape
    red = w1_bf16.shape[1]
    return pl.pallas_call(
        functools.partial(_se_gate_kernel, inv_hw=1.0 / float(HW)),
        out_shape=jax.ShapeDtypeStruct((B, C), jnp.float32),
        grid=(B,),
        in_specs=[pl.BlockSpec((1, HW, C), lambda bb: (bb, 0, 0)),
                  pl.BlockSpec((C, red), lambda bb: (0, 0)),
                  pl.BlockSpec((red, C), lambda bb: (0, 0))],
        out_specs=pl.BlockSpec((1, C), lambda bb: (bb, 0)),
        compiler_params=_cparams(),
    )(x_b_hw_c, w1_bf16, w2_bf16)


def _scale_pw2_kernel(*refs, act, has_res):
    """Fused SE-scale + nonlinearity + 1x1 project matmul (+ residual)."""
    if has_res:
        x_ref, g_ref, w_ref, b_ref, r_ref, o_ref = refs
    else:
        x_ref, g_ref, w_ref, b_ref, o_ref = refs
        r_ref = None
    y = _act(x_ref[0] * g_ref[...], act)                  # (HW, Cexp)
    y = jnp.dot(y.astype(jnp.bfloat16), w_ref[...],
                preferred_element_type=jnp.float32) + b_ref[...]
    if r_ref is not None:
        y = y + r_ref[0]
    o_ref[0] = y


def se_scale_act_pw2(x_b_hw_c, g, w_bf16, b, act, residual=None):
    B, HW, Cexp = x_b_hw_c.shape
    Cout = w_bf16.shape[1]
    in_specs = [pl.BlockSpec((1, HW, Cexp), lambda bb: (bb, 0, 0)),
                pl.BlockSpec((1, Cexp), lambda bb: (bb, 0)),
                pl.BlockSpec((Cexp, Cout), lambda bb: (0, 0)),
                pl.BlockSpec((1, Cout), lambda bb: (0, 0))]
    ins = [x_b_hw_c, g, w_bf16, b]
    if residual is not None:
        in_specs.append(pl.BlockSpec((1, HW, Cout), lambda bb: (bb, 0, 0)))
        ins.append(residual)
    return pl.pallas_call(
        functools.partial(_scale_pw2_kernel, act=act,
                          has_res=residual is not None),
        out_shape=jax.ShapeDtypeStruct((B, HW, Cout), jnp.float32),
        grid=(B,),
        in_specs=in_specs,
        out_specs=pl.BlockSpec((1, HW, Cout), lambda bb: (bb, 0, 0)),
        compiler_params=_cparams(),
    )(*ins)


def _tail_kernel(x_ref, wl_ref, bl_ref, wh_ref, bh_ref, o_ref, *, inv_hw):
    """Fused tail: last 1x1 conv + BN + Hswish -> global pool -> head conv
    (with bias) + Hswish."""
    x = x_ref[0]                                          # (HW, Cin)
    h = jnp.dot(x.astype(jnp.bfloat16), wl_ref[...],
                preferred_element_type=jnp.float32)
    h = _act(h + bl_ref[...], 'hswish')                   # (HW, 576)
    m = jnp.sum(h, axis=0, keepdims=True) * inv_hw        # (1, 576)
    y = jnp.dot(m.astype(jnp.bfloat16), wh_ref[...],
                preferred_element_type=jnp.float32)
    o_ref[...] = _act(y + bh_ref[...], 'hswish')          # (1, 1280)


def tail(x_b_hw_c, wl_bf16, bl, wh_bf16, bh):
    B, HW, Cin = x_b_hw_c.shape
    Cl = wl_bf16.shape[1]
    Ch = wh_bf16.shape[1]
    return pl.pallas_call(
        functools.partial(_tail_kernel, inv_hw=1.0 / float(HW)),
        out_shape=jax.ShapeDtypeStruct((B, Ch), jnp.float32),
        grid=(B,),
        in_specs=[pl.BlockSpec((1, HW, Cin), lambda bb: (bb, 0, 0)),
                  pl.BlockSpec((Cin, Cl), lambda bb: (0, 0)),
                  pl.BlockSpec((1, Cl), lambda bb: (0, 0)),
                  pl.BlockSpec((Cl, Ch), lambda bb: (0, 0)),
                  pl.BlockSpec((1, Ch), lambda bb: (0, 0))],
        out_specs=pl.BlockSpec((1, Ch), lambda bb: (bb, 0)),
        compiler_params=_cparams(),
    )(x_b_hw_c, wl_bf16, bl, wh_bf16, bh)


# ---------------- parameters (BN folded, weights pre-transposed) ----------------

def init_params(key):
    keys = iter(jax.random.split(key, 192))

    def nrm(shape, std):
        return jax.random.normal(next(keys), shape, jnp.float32) * std

    def kaiming_conv(shape):  # (out, in, kh, kw); fan_out = out*kh*kw
        fan_out = shape[0] * shape[2] * shape[3]
        return nrm(shape, float(np.sqrt(2.0 / fan_out)))

    params = {}
    # stem: Conv2d(1,16,3,2,1,bias=False) + BN + Hswish (tap-MAC weights)
    w = kaiming_conv((16, 1, 3, 3))
    params['stem_w'] = w[:, 0].transpose(1, 2, 0).reshape(9, 16) * BN_SCALE
    params['stem_b'] = jnp.zeros((1, 16), jnp.float32)

    blocks = []
    in_ch = 16
    for k, exp, c, se, nl, s in MOBILE_SETTING_SMALL:
        oup = make_divisible(c)
        expc = make_divisible(exp)
        pw1 = kaiming_conv((expc, in_ch, 1, 1))
        dw = kaiming_conv((expc, 1, k, k))
        pw2 = kaiming_conv((oup, expc, 1, 1))
        blk = {
            'k': k, 'stride': s, 'se': se,
            'nl': 'relu' if nl == 'RE' else 'hswish',
            'res': (s == 1 and in_ch == oup),
            'pw1_w': (pw1[:, :, 0, 0].T * BN_SCALE).astype(jnp.bfloat16),
            'pw1_b': jnp.zeros((1, expc), jnp.float32),
            'dw_w': dw[:, 0].transpose(1, 2, 0).reshape(k * k, expc) * BN_SCALE,
            'dw_b': jnp.zeros((1, expc), jnp.float32),
            'pw2_w': (pw2[:, :, 0, 0].T * BN_SCALE).astype(jnp.bfloat16),
            'pw2_b': jnp.zeros((1, oup), jnp.float32),
        }
        if se:
            red = expc // 4
            # nn.Linear(expc->red, bias=False), nn.Linear(red->expc, bias=False)
            # initialized N(0, 0.01) as in _initialize_weights.
            blk['se_w1'] = nrm((red, expc), 0.01).T.astype(jnp.bfloat16)  # (expc,red)
            blk['se_w2'] = nrm((expc, red), 0.01).T.astype(jnp.bfloat16)  # (red,expc)
        blocks.append(blk)
        in_ch = oup
    params['blocks'] = blocks

    last_conv = make_divisible(576)
    w = kaiming_conv((last_conv, in_ch, 1, 1))
    params['last_w'] = (w[:, :, 0, 0].T * BN_SCALE).astype(jnp.bfloat16)
    params['last_b'] = jnp.zeros((1, last_conv), jnp.float32)
    w = kaiming_conv((1280, last_conv, 1, 1))
    params['head_w'] = w[:, :, 0, 0].T.astype(jnp.bfloat16)
    params['head_b'] = jnp.zeros((1, 1280), jnp.float32)   # conv bias init zeros
    return params


# ---------------- network ----------------

def mobile_bottleneck(blk, x4):
    B, H, W, Cin = x4.shape
    nl = blk['nl']
    Cexp = blk['pw1_w'].shape[1]
    Cout = blk['pw2_w'].shape[1]
    # 1) pointwise expand + BN + nlin (M-tiled MXU matmul)
    e = matmul_bias_act(x4.reshape(B * H * W, Cin), blk['pw1_w'], blk['pw1_b'],
                        act=nl)
    e4 = e.reshape(B, H, W, Cexp)
    # 2) depthwise + BN (+ nlin fused when no SE); taps built in-kernel
    dw_act = 'none' if blk['se'] else nl
    d4 = dwconv_bn_act(e4, blk['dw_w'], blk['dw_b'], k=blk['k'],
                       s=blk['stride'], act=dw_act, cout=Cexp)
    _, Ho, Wo, _ = d4.shape
    if blk['se']:
        # 3) fused SE gate, then fused scale + nlin + project (+ residual)
        d3 = d4.reshape(B, Ho * Wo, Cexp)
        g = se_gate(d3, blk['se_w1'], blk['se_w2'])                 # (B, Cexp)
        res3 = x4.reshape(B, Ho * Wo, Cout) if blk['res'] else None
        o3 = se_scale_act_pw2(d3, g, blk['pw2_w'], blk['pw2_b'], act=nl,
                              residual=res3)
        return o3.reshape(B, Ho, Wo, Cout)
    # 4) pointwise project + BN (+ residual)
    res = x4.reshape(B * Ho * Wo, Cout) if blk['res'] else None
    o = matmul_bias_act(d4.reshape(B * Ho * Wo, Cexp), blk['pw2_w'],
                        blk['pw2_b'], act='none', residual=res)
    return o.reshape(B, Ho, Wo, Cout)


def mobilenetv3_small_forward(params, x_nchw):
    # QuantStub / DeQuantStub are identity in the float model.
    x = jnp.transpose(x_nchw.astype(jnp.float32), (0, 2, 3, 1))   # NCHW -> NHWC
    # stem conv (Cin=1 -> 16, stride 2) as a tap-MAC, BN + Hswish fused
    h4 = dwconv_bn_act(x, params['stem_w'], params['stem_b'], k=3, s=2,
                       act='hswish', cout=16)
    for blk in params['blocks']:
        h4 = mobile_bottleneck(blk, h4)
    # fused tail: last 1x1 conv + BN + Hswish -> AdaptiveAvgPool2d(1)
    #             -> Conv2d(576,1280,1) + bias + Hswish
    B, H, W, C = h4.shape
    out = tail(h4.reshape(B, H * W, C), params['last_w'], params['last_b'],
               params['head_w'], params['head_b'])                 # (B, 1280)
    return out.reshape(B, 1280, 1, 1)                              # NCHW (H=W=1)


if __name__ == "__main__":
    key = jax.random.PRNGKey(0)
    pkey, xkey = jax.random.split(key)
    params = init_params(pkey)
    # MobileNetV3 here takes a single-channel NCHW image (Conv2d(1, 16, ...)).
    x = jax.random.normal(xkey, (2, 1, 16, 16), jnp.float32)
    out = mobilenetv3_small_forward(params, x)
    out = jax.block_until_ready(out)
    assert out.shape == (2, 1280, 1, 1), out.shape
    assert bool(jnp.all(jnp.isfinite(out)))
    print("KERNEL_OK")
</pallas_src>

<mosaic_0001>
module attributes {stable_mosaic.version = 11 : i64} {
  func.func @_dw_kernel(%arg0: i32, %arg1: memref<1x36x9x1xf32, #tpu.memory_space<vmem>>, %arg2: memref<9x16xf32, #tpu.memory_space<vmem>>, %arg3: memref<1x16xf32, #tpu.memory_space<vmem>>, %arg4: memref<1x8x8x16xf32, #tpu.memory_space<vmem>>) attributes {dimension_semantics = [#tpu.dimension_semantics<parallel>], iteration_bounds = array<i64: 2>, scalar_prefetch = 0 : i64, scratch_operands = 0 : i64, tpu.core_type = #tpu.core_type<tc>, window_params = [{transform_indices = @transform_0, window_bounds = array<i64: 1, 36, 9, 1>}, {pipeline_mode = #tpu.pipeline_mode<synchronous>, transform_indices = @transform_1, window_bounds = array<i64: 9, 16>}, {pipeline_mode = #tpu.pipeline_mode<synchronous>, transform_indices = @transform_2, window_bounds = array<i64: 1, 16>}, {transform_indices = @transform_3, window_bounds = array<i64: 1, 8, 8, 16>}]} {
    %c0 = arith.constant 0 : index
    %c0_0 = arith.constant 0 : index
    %c0_1 = arith.constant 0 : index
    %c0_2 = arith.constant 0 : index
    %0 = vector.load %arg1[%c0, %c0_0, %c0_1, %c0_2] : memref<1x36x9x1xf32, #tpu.memory_space<vmem>>, vector<1x8x8x1xf32>
    %1 = vector.shape_cast %0 : vector<1x8x8x1xf32> to vector<8x8x1xf32>
    %c0_3 = arith.constant 0 : index
    %c0_4 = arith.constant 0 : index
    %2 = vector.load %arg2[%c0_3, %c0_4] : memref<9x16xf32, #tpu.memory_space<vmem>>, vector<1x16xf32>
    %3 = vector.shape_cast %2 : vector<1x16xf32> to vector<1x1x16xf32>
    %4 = vector.broadcast %1 : vector<8x8x1xf32> to vector<8x8x16xf32>
    %5 = vector.broadcast %3 : vector<1x1x16xf32> to vector<8x8x16xf32>
    %6 = arith.mulf %4, %5 : vector<8x8x16xf32>
    %c0_5 = arith.constant 0 : index
    %c9 = arith.constant 9 : index
    %c0_6 = arith.constant 0 : index
    %c0_7 = arith.constant 0 : index
    %7 = vector.load %arg1[%c0_5, %c9, %c0_6, %c0_7] : memref<1x36x9x1xf32, #tpu.memory_space<vmem>>, vector<1x8x8x1xf32>
    %8 = vector.shape_cast %7 : vector<1x8x8x1xf32> to vector<8x8x1xf32>
    %c1 = arith.constant 1 : index
    %c0_8 = arith.constant 0 : index
    %9 = vector.load %arg2[%c1, %c0_8] : memref<9x16xf32, #tpu.memory_space<vmem>>, vector<1x16xf32>
    %10 = vector.shape_cast %9 : vector<1x16xf32> to vector<1x1x16xf32>
    %11 = vector.broadcast %8 : vector<8x8x1xf32> to vector<8x8x16xf32>
    %12 = vector.broadcast %10 : vector<1x1x16xf32> to vector<8x8x16xf32>
    %13 = arith.mulf %11, %12 : vector<8x8x16xf32>
    %14 = arith.addf %6, %13 : vector<8x8x16xf32>
    %c0_9 = arith.constant 0 : index
    %c0_10 = arith.constant 0 : index
    %c1_11 = arith.constant 1 : index
    %c0_12 = arith.constant 0 : index
    %15 = vector.load %arg1[%c0_9, %c0_10, %c1_11, %c0_12] : memref<1x36x9x1xf32, #tpu.memory_space<vmem>>, vector<1x8x8x1xf32>
    %16 = vector.shape_cast %15 : vector<1x8x8x1xf32> to vector<8x8x1xf32>
    %c2 = arith.constant 2 : index
    %c0_13 = arith.constant 0 : index
    %17 = vector.load %arg2[%c2, %c0_13] : memref<9x16xf32, #tpu.memory_space<vmem>>, vector<1x16xf32>
    %18 = vector.shape_cast %17 : vector<1x16xf32> to vector<1x1x16xf32>
    %19 = vector.broadcast %16 : vector<8x8x1xf32> to vector<8x8x16xf32>
    %20 = vector.broadcast %18 : vector<1x1x16xf32> to vector<8x8x16xf32>
    %21 = arith.mulf %19, %20 : vector<8x8x16xf32>
    %22 = arith.addf %14, %21 : vector<8x8x16xf32>
    %c0_14 = arith.constant 0 : index
    %c18 = arith.constant 18 : index
    %c0_15 = arith.constant 0 : index
    %c0_16 = arith.constant 0 : index
    %23 = vector.load %arg1[%c0_14, %c18, %c0_15, %c0_16] : memref<1x36x9x1xf32, #tpu.memory_space<vmem>>, vector<1x8x8x1xf32>
    %24 = vector.shape_cast %23 : vector<1x8x8x1xf32> to vector<8x8x1xf32>
    %c3 = arith.constant 3 : index
    %c0_17 = arith.constant 0 : index
    %25 = vector.load %arg2[%c3, %c0_17] : memref<9x16xf32, #tpu.memory_space<vmem>>, vector<1x16xf32>
    %26 = vector.shape_cast %25 : vector<1x16xf32> to vector<1x1x16xf32>
    %27 = vector.broadcast %24 : vector<8x8x1xf32> to vector<8x8x16xf32>
    %28 = vector.broadcast %26 : vector<1x1x16xf32> to vector<8x8x16xf32>
    %29 = arith.mulf %27, %28 : vector<8x8x16xf32>
    %30 = arith.addf %22, %29 : vector<8x8x16xf32>
    %c0_18 = arith.constant 0 : index
    %c27 = arith.constant 27 : index
    %c0_19 = arith.constant 0 : index
    %c0_20 = arith.constant 0 : index
    %31 = vector.load %arg1[%c0_18, %c27, %c0_19, %c0_20] : memref<1x36x9x1xf32, #tpu.memory_space<vmem>>, vector<1x8x8x1xf32>
    %32 = vector.shape_cast %31 : vector<1x8x8x1xf32> to vector<8x8x1xf32>
    %c4 = arith.constant 4 : index
    %c0_21 = arith.constant 0 : index
    %33 = vector.load %arg2[%c4, %c0_21] : memref<9x16xf32, #tpu.memory_space<vmem>>, vector<1x16xf32>
    %34 = vector.shape_cast %33 : vector<1x16xf32> to vector<1x1x16xf32>
    %35 = vector.broadcast %32 : vector<8x8x1xf32> to vector<8x8x16xf32>
    %36 = vector.broadcast %34 : vector<1x1x16xf32> to vector<8x8x16xf32>
    %37 = arith.mulf %35, %36 : vector<8x8x16xf32>
    %38 = arith.addf %30, %37 : vector<8x8x16xf32>
    %c0_22 = arith.constant 0 : index
    %c18_23 = arith.constant 18 : index
    %c1_24 = arith.constant 1 : index
    %c0_25 = arith.constant 0 : index
    %39 = vector.load %arg1[%c0_22, %c18_23, %c1_24, %c0_25] : memref<1x36x9x1xf32, #tpu.memory_space<vmem>>, vector<1x8x8x1xf32>
    %40 = vector.shape_cast %39 : vector<1x8x8x1xf32> to vector<8x8x1xf32>
    %c5 = arith.constant 5 : index
    %c0_26 = arith.constant 0 : index
    %41 = vector.load %arg2[%c5, %c0_26] : memref<9x16xf32, #tpu.memory_space<vmem>>, vector<1x16xf32>
    %42 = vector.shape_cast %41 : vector<1x16xf32> to vector<1x1x16xf32>
    %43 = vector.broadcast %40 : vector<8x8x1xf32> to vector<8x8x16xf32>
    %44 = vector.broadcast %42 : vector<1x1x16xf32> to vector<8x8x16xf32>
    %45 = arith.mulf %43, %44 : vector<8x8x16xf32>
    %46 = arith.addf %38, %45 : vector<8x8x16xf32>
    %c0_27 = arith.constant 0 : index
    %c1_28 = arith.constant 1 : index
    %c0_29 = arith.constant 0 : index
    %c0_30 = arith.constant 0 : index
    %47 = vector.load %arg1[%c0_27, %c1_28, %c0_29, %c0_30] : memref<1x36x9x1xf32, #tpu.memory_space<vmem>>, vector<1x8x8x1xf32>
    %48 = vector.shape_cast %47 : vector<1x8x8x1xf32> to vector<8x8x1xf32>
    %c6 = arith.constant 6 : index
    %c0_31 = arith.constant 0 : index
    %49 = vector.load %arg2[%c6, %c0_31] : memref<9x16xf32, #tpu.memory_space<vmem>>, vector<1x16xf32>
    %50 = vector.shape_cast %49 : vector<1x16xf32> to vector<1x1x16xf32>
    %51 = vector.broadcast %48 : vector<8x8x1xf32> to vector<8x8x16xf32>
    %52 = vector.broadcast %50 : vector<1x1x16xf32> to vector<8x8x16xf32>
    %53 = arith.mulf %51, %52 : vector<8x8x16xf32>
    %54 = arith.addf %46, %53 : vector<8x8x16xf32>
    %c0_32 = arith.constant 0 : index
    %c10 = arith.constant 10 : index
    %c0_33 = arith.constant 0 : index
    %c0_34 = arith.constant 0 : index
    %55 = vector.load %arg1[%c0_32, %c10, %c0_33, %c0_34] : memref<1x36x9x1xf32, #tpu.memory_space<vmem>>, vector<1x8x8x1xf32>
    %56 = vector.shape_cast %55 : vector<1x8x8x1xf32> to vector<8x8x1xf32>
    %c7 = arith.constant 7 : index
    %c0_35 = arith.constant 0 : index
    %57 = vector.load %arg2[%c7, %c0_35] : memref<9x16xf32, #tpu.memory_space<vmem>>, vector<1x16xf32>
    %58 = vector.shape_cast %57 : vector<1x16xf32> to vector<1x1x16xf32>
    %59 = vector.broadcast %56 : vector<8x8x1xf32> to vector<8x8x16xf32>
    %60 = vector.broadcast %58 : vector<1x1x16xf32> to vector<8x8x16xf32>
    %61 = arith.mulf %59, %60 : vector<8x8x16xf32>
    %62 = arith.addf %54, %61 : vector<8x8x16xf32>
    %c0_36 = arith.constant 0 : index
    %c1_37 = arith.constant 1 : index
    %c1_38 = arith.constant 1 : index
    %c0_39 = arith.constant 0 : index
    %63 = vector.load %arg1[%c0_36, %c1_37, %c1_38, %c0_39] : memref<1x36x9x1xf32, #tpu.memory_space<vmem>>, vector<1x8x8x1xf32>
    %64 = vector.shape_cast %63 : vector<1x8x8x1xf32> to vector<8x8x1xf32>
    %c8 = arith.constant 8 : index
    %c0_40 = arith.constant 0 : index
    %65 = vector.load %arg2[%c8, %c0_40] : memref<9x16xf32, #tpu.memory_space<vmem>>, vector<1x16xf32>
    %66 = vector.shape_cast %65 : vector<1x16xf32> to vector<1x1x16xf32>
    %67 = vector.broadcast %64 : vector<8x8x1xf32> to vector<8x8x16xf32>
    %68 = vector.broadcast %66 : vector<1x1x16xf32> to vector<8x8x16xf32>
    %69 = arith.mulf %67, %68 : vector<8x8x16xf32>
    %70 = arith.addf %62, %69 : vector<8x8x16xf32>
    %c0_41 = arith.constant 0 : index
    %c0_42 = arith.constant 0 : index
    %71 = vector.load %arg3[%c0_41, %c0_42] : memref<1x16xf32, #tpu.memory_space<vmem>>, vector<1x16xf32>
    %72 = vector.shape_cast %71 : vector<1x16xf32> to vector<1x1x16xf32>
    %73 = vector.broadcast %72 : vector<1x1x16xf32> to vector<8x8x16xf32>
    %74 = arith.addf %70, %73 : vector<8x8x16xf32>
    %cst = arith.constant 3.000000e+00 : f32
    %75 = vector.broadcast %cst : f32 to vector<8x8x16xf32>
    %76 = arith.addf %74, %75 : vector<8x8x16xf32>
    %cst_43 = arith.constant 0.000000e+00 : f32
    %cst_44 = arith.constant 6.000000e+00 : f32
    %77 = vector.broadcast %cst_43 : f32 to vector<8x8x16xf32>
    %78 = arith.maximumf %77, %76 : vector<8x8x16xf32>
    %79 = vector.broadcast %cst_44 : f32 to vector<8x8x16xf32>
    %80 = arith.minimumf %79, %78 : vector<8x8x16xf32>
    %cst_45 = arith.constant 0.166666672 : f32
    %81 = vector.broadcast %cst_45 : f32 to vector<8x8x16xf32>
    %82 = arith.mulf %80, %81 : vector<8x8x16xf32>
    %83 = arith.mulf %74, %82 : vector<8x8x16xf32>
    %c0_46 = arith.constant 0 : index
    %c0_47 = arith.constant 0 : index
    %c0_48 = arith.constant 0 : index
    %c0_49 = arith.constant 0 : index
    %84 = vector.load %arg4[%c0_46, %c0_47, %c0_48, %c0_49] : memref<1x8x8x16xf32, #tpu.memory_space<vmem>>, vector<1x8x8x16xf32>
    %85 = vector.shape_cast %84 : vector<1x8x8x16xf32> to vector<8x8x16xf32>
    %86 = vector.shape_cast %83 : vector<8x8x16xf32> to vector<1x8x8x16xf32>
    tpu.vector_store %arg4[%c0_46, %c0_47, %c0_48, %c0_49], %86 {strides = array<i32>} : memref<1x8x8x16xf32, #tpu.memory_space<vmem>>, vector<1x8x8x16xf32>,
    return
  }
  func.func @transform_0(%arg0: i32) -> (i32, i32, i32, i32) {
    %c0_i32 = arith.constant 0 : i32
    %c0_i32_0 = arith.constant 0 : i32
    %c0_i32_1 = arith.constant 0 : i32
    %c0_i32_2 = arith.constant 0 : i32
    return %arg0, %c0_i32, %c0_i32_0, %c0_i32_1 : i32, i32, i32, i32
  }
  func.func @transform_1(%arg0: i32) -> (i32, i32) {
    %c0_i32 = arith.constant 0 : i32
    %c0_i32_0 = arith.constant 0 : i32
    %c0_i32_1 = arith.constant 0 : i32
    return %c0_i32, %c0_i32_0 : i32, i32
  }
  func.func @transform_2(%arg0: i32) -> (i32, i32) {
    %c0_i32 = arith.constant 0 : i32
    %c0_i32_0 = arith.constant 0 : i32
    %c0_i32_1 = arith.constant 0 : i32
    return %c0_i32, %c0_i32_0 : i32, i32
  }
  func.func @transform_3(%arg0: i32) -> (i32, i32, i32, i32) {
    %c0_i32 = arith.constant 0 : i32
    %c0_i32_0 = arith.constant 0 : i32
    %c0_i32_1 = arith.constant 0 : i32
    %c0_i32_2 = arith.constant 0 : i32
    return %arg0, %c0_i32, %c0_i32_0, %c0_i32_1 : i32, i32, i32, i32
  }
}

</mosaic_0001>

<bundles_post_ra>
// kernel: tpu_custom_call.1
= control target key start
LH: loop header
LB: loop body
LE: loop exit
PB: predicated region body
PF: predicated region fallthrough
CT: control target
= control target key end

     0   :  { %8 = vsyncpa [#allocation3], 0  ;;  %s1516_s0 = inlined_call_operand.vmem [shape: f32[2,36,9,1], index: 0, kind: input, shape index: {}]   ;;  %s1517_s1 = inlined_call_operand.vmem [shape: f32[9,16], index: 1, kind: input, shape index: {}]   ;;  %s1518_s2 = inlined_call_operand.vmem [shape: f32[1,16], index: 2, kind: input, shape index: {}]   ;;  %s1519_s3 = inlined_call_operand.hbm [shape: f32[2,8,8,16], index: 3, kind: output, shape index: {}]  }
   0x1   :  { %10 = vsyncpa [#allocation3 + $0x1], 0  ;;  %s1110_s12 = smov 0   ;;  %s1112_s13 = smov 0  }
   0x2   :  { %s1114_s14 = smov 0   ;;  %s1116_s15 = smov 0  }
   0x3 LB: > { %s1131_s16 = sadd.s32 4294967295, %s1085_s15   ;;  %s899_s17 = sadd.s32 4294967294, %s1085_s15   ;;  %s1085_s15 = sphi %s1116_s15, %s1525_s15   ;;  %s1081_s14 = sphi %s1114_s14, %s1524_s14   ;;  %s1077_s13 = sphi %s1112_s13, %s1523_s13   ;;  %s1073_s12 = sphi %s1110_s12, %s1522_s12  }
   0x4   : > { %s1135_s18 = sadd.s32 1, %s1085_s15   ;;  %s91_s19 = sadd.s32 1, %s1081_s14 }
   0x5   : > { %s88_s20 = ssub.s32 %s1085_s15, %s1135_s18  ;;  %p101_p0 = scmp.ne.s32.totalorder %s1081_s14, %s1077_s13 }
   0x6   : > { %p89_p1 = scmp.eq.s32.totalorder %s88_s20, 0  ;;  %p102_p2 = scmp.eq.s32.totalorder %s1131_s16, 1 }
   0x7   : > { %p107_p3 = scmp.ne.s32.totalorder %s1077_s13, %s1073_s12  ;;  %p108_p4 = scmp.eq.s32.totalorder %s899_s17, 1 }
   0x8   : > { %s1146_s21 = scalar_select %p89_p1, %s1081_s14, %s91_s19  }
   0x9   : > { %p1148_p5 = por %p102_p2, %p101_p0  ;;  %p1152_p6 = por %p108_p4, %p107_p3 }
   0xa   : > { %p902_p7 = scmp.ge.s32.totalorder %s1085_s15, 1  ;;  %p140_p8 = scmp.lt.s32.totalorder %s1085_s15, 3 }
   0xc   : > { %p141_p9 = pnand %p902_p7, %p140_p8 }
   0xd   : > { %p164_p10 = scmp.lt.s32.totalorder (!%p141_p9), %s1131_s16, 1  ;;  %s161_s4 = sand.u32 (!%p141_p9), 1, %s1077_s13  }
   0xe   : > { %144 = sbr.rel (%p141_p9) target bundleno = 346 (0x15a), region = 32  ;;  %s903_s5 = sshll.u32 (!%p141_p9), %s161_s4, 6 }
   0xf   : > { %s1434_s6 = scalar_lea.vmem (!%p141_p9), [#allocation2], %s903_s5  ;;  %s966_s7 = sshll.u32 (!%p141_p9), %s1131_s16, 6 }
  0x10   : > { %s833_s10 = scalar_lea.hbm (!%p141_p9), %s1519_s3, %s966_s7  ;;  %s822_s17 = scalar_lea.sflag (!%p141_p9), [#allocation3], %s161_s4 }
  0x11   : > { %s836_s11 = sshll.u32 (!%p141_p9), %s833_s10, 4  ;;  %s1043_s26 = scalar_lea.hbm (!%p141_p9), %s1519_s3, 128  ;;  %s837_s11 = int_to_ptr.hbm [resolvable:$true] %s836_s11 }
  0x12   : > { %s1037_s19 = sshra.s32 (!%p141_p9), %s837_s11, 4  ;;  %s1038_s19 = int_to_ptr.hbm [resolvable:$true] %s1037_s19 }
  0x13   : > { %v1087_v0 = vmov 0   ;;  %s165_s24 = scalar_select %p164_p10, %s1131_s16, 1  ;;  %v1279_v48 = vld [vmem:[%s1517_s1 + $0x1] ss:$0 sm:$0xff]  ;;  %v1285_v50 = vld [vmem:[%s1517_s1] ss:$0 sm:$0xff] }
  0x14   : > { %1012 = vset.pattern.permute.xlu2 %v1087_v0  ;;  %1011 = vset.pattern.permute.xlu1 %v1087_v0  ;;  %vm812_vm0 = vcmask 130048   ;;  %s834_s16 = sshll.u32 %s1434_s6, 4  ;;  %s1039_s20 = scalar_lea.hbm %s1038_s19, 64  ;;  %s835_s16 = int_to_ptr.vmem [resolvable:$true] %s834_s16 }
  0x15   : > { %1010 = vset.pattern.permute.xlu0 %v1087_v0  ;;  %s967_s25 = smul.u32 576, %s165_s24  ;;  %p1040_p11 = scmp.ne.s32.totalorder %s1038_s19, %s1039_s20 }
  0x16   : > { %p1044_p0 = scmp.lt.s32.totalorder %s1038_s19, %s1519_s3  ;;  %p1045_p1 = scmp.lt.s32.totalorder %s1043_s26, %s1039_s20 }
  0x17   : > { %s1163_s28 = scalar_lea.vmem %s1516_s0, %s967_s25  ;;  %p1041_p12 = pnand %p1040_p11, %p1148_p5 }
  0x18   : > { %v1166_v1 = vld [vmem:[%s1163_s28 + $0x40] sm:$0xff]  ;;  %v1175_v4 = vld [vmem:[%s1163_s28 + $0x50] sm:$0xff]  ;;  %p1046_p2 = por %p1045_p1, %p1044_p0 }
  0x19   : > { %v1169_v2 = vld [vmem:[%s1163_s28 + $0x20] sm:$0xff]  ;;  %200 = vperm.xlu2 %1012, %v1166_v1   ;;  %v1178_v5 = vld [vmem:[%s1163_s28 + $0x30] sm:$0xff]  ;;  %p1042_p13 = pneg %p1041_p12 }
  0x1a   : > { %v169_v3 = vld [vmem:[%s1163_s28] sm:$0xff]  ;;  %190 = vperm.xlu1 %1011, %v1169_v2   ;;  %v1181_v6 = vld [vmem:[%s1163_s28 + $0x10] sm:$0xff] }
  0x1b   : > { %180 = vperm.xlu0 %1010, %v169_v3   ;;  %v905_v7 = vld [vmem:[%s1163_s28 + $0x90] sm:$0xff]  ;;  %v1191_v9 = vld [vmem:[%s1163_s28 + $0x60] sm:$0xff]  ;;  %p1047_p3 = pnand %p1046_p2, %p1042_p13 }
  0x1c   : > { %v1188_v8 = vld [vmem:[%s1163_s28 + $0x70] sm:$0xff]  ;;  %v1196_v10 = vld [vmem:[%s1163_s28 + $0xc0] sm:$0xff] }
  0x1d   : > { %v1199_v11 = vld [vmem:[%s1163_s28 + $0xb0] sm:$0xff]  ;;  %v1202_v12 = vld [vmem:[%s1163_s28 + $0xa0] sm:$0xff] }
  0x1e   : > { %v1208_v13 = vld [vmem:[%s1163_s28 + $0xf0] sm:$0xff]  ;;  %v1211_v14 = vld [vmem:[%s1163_s28 + $0xe0] sm:$0xff] }
  0x1f   : > { %v1214_v15 = vld [vmem:[%s1163_s28 + $0xd0] sm:$0xff]  ;;  %v294_v17 = vld [vmem:[%s1163_s28 + $0x1] sm:$0xff] }
  0x20   : > { %v1220_v16 = vld [vmem:[%s1163_s28 + $0x11] sm:$0xff]  ;;  %v1224_v18 = vld [vmem:[%s1163_s28 + $0x100] sm:$0xff] }
  0x21   : > { %205 = vperm.xlu2 %1012, %v1175_v4   ;;  %v1229_v19 = vld [vmem:[%s1163_s28 + $0x41] sm:$0xff]  ;;  %v1232_v20 = vld [vmem:[%s1163_s28 + $0x31] sm:$0xff] }
  0x22   : > { %195 = vperm.xlu1 %1011, %v1178_v5   ;;  %v1235_v21 = vld [vmem:[%s1163_s28 + $0x21] sm:$0xff]  ;;  %v1241_v22 = vld [vmem:[%s1163_s28 + $0x71] sm:$0xff] }
  0x23   : > { %185 = vperm.xlu0 %1010, %v1181_v6   ;;  %v1244_v23 = vld [vmem:[%s1163_s28 + $0x61] sm:$0xff]  ;;  %v1247_v24 = vld [vmem:[%s1163_s28 + $0x51] sm:$0xff] }
  0x24   : > { %v915_v25 = vld [vmem:[%s1163_s28 + $0x140] sm:$0xff]  ;;  %v914_v26 = vld [vmem:[%s1163_s28 + $0x130] sm:$0xff] }
  0x25   : > { %v913_v27 = vld [vmem:[%s1163_s28 + $0x120] sm:$0xff]  ;;  %v918_v28 = vld [vmem:[%s1163_s28 + $0x170] sm:$0xff] }
  0x26   : > { %v917_v29 = vld [vmem:[%s1163_s28 + $0x160] sm:$0xff]  ;;  %v916_v30 = vld [vmem:[%s1163_s28 + $0x150] sm:$0xff] }
  0x27   : > { %v921_v31 = vld [vmem:[%s1163_s28 + $0x1b0] sm:$0xff]  ;;  %v919_v33 = vld [vmem:[%s1163_s28 + $0x180] sm:$0xff] }
  0x28   : > { %v920_v32 = vld [vmem:[%s1163_s28 + $0x190] sm:$0xff]  ;;  %v924_v34 = vld [vmem:[%s1163_s28 + $0x1e0] sm:$0xff] }
  0x29   : > { %239 = vperm.xlu2 %1012, %v905_v7   ;;  %v923_v35 = vld [vmem:[%s1163_s28 + $0x1d0] sm:$0xff]  ;;  %v922_v36 = vld [vmem:[%s1163_s28 + $0x1c0] sm:$0xff] }
  0x2a   : > { %215 = vperm.xlu1 %1011, %v1188_v8   ;;  %v927_v38 = vld [vmem:[%s1163_s28 + $0x210] sm:$0xff]  ;;  %v926_v39 = vld [vmem:[%s1163_s28 + $0x200] sm:$0xff] }
  0x2b   : > { %210 = vperm.xlu0 %1010, %v1191_v9   ;;  %v925_v40 = vld [vmem:[%s1163_s28 + $0x1f0] sm:$0xff]  ;;  %v929_v43 = vld [vmem:[%s1163_s28 + $0x121] sm:$0xff] }
  0x2c   : > { %v930_v42 = vld [vmem:[%s1163_s28 + $0x131] sm:$0xff]  ;;  %v928_v44 = vld [vmem:[%s1163_s28 + $0x220] sm:$0xff] }
  0x2d   : > { %v933_v46 = vld [vmem:[%s1163_s28 + $0x161] sm:$0xff]  ;;  %v932_v47 = vld [vmem:[%s1163_s28 + $0x151] sm:$0xff] }
  0x2e   : > { %v931_v49 = vld [vmem:[%s1163_s28 + $0x141] sm:$0xff]  ;;  %v936_v56 = vld [vmem:[%s1163_s28 + $0x191] sm:$0xff] }
  0x2f   : > { %v935_v57 = vld [vmem:[%s1163_s28 + $0x181] sm:$0xff]  ;;  %v934_v59 = vld [vmem:[%s1163_s28 + $0x171] sm:$0xff] }
  0x31   : > { %254 = vperm.xlu2 %1012, %v1196_v10  }
  0x32   : > { %249 = vperm.xlu1 %1011, %v1199_v11  }
  0x33   : > { %244 = vperm.xlu0 %1010, %v1202_v12  }
  0x39   : > { %269 = vperm.xlu2 %1012, %v1208_v13  }
  0x3a   : > { %264 = vperm.xlu1 %1011, %v1211_v14  }
  0x3b   : > { %259 = vperm.xlu0 %1010, %v1214_v15  }
  0x41   : > { %310 = vperm.xlu2 %1012, %v1220_v16  }
  0x42   : > { %305 = vperm.xlu1 %1011, %v294_v17  }
  0x43   : > { %274 = vperm.xlu0 %1010, %v1224_v18  }
  0x49   : > { %325 = vperm.xlu2 %1012, %v1229_v19  }
  0x4a   : > { %320 = vperm.xlu1 %1011, %v1232_v20  }
  0x4b   : > { %315 = vperm.xlu0 %1010, %v1235_v21  }
  0x51   : > { %340 = vperm.xlu2 %1012, %v1241_v22  }
  0x52   : > { %335 = vperm.xlu1 %1011, %v1244_v23  }
  0x53   : > { %330 = vperm.xlu0 %1010, %v1247_v24  }
  0x59   : > { %382 = vperm.xlu2 %1012, %v915_v25  }
  0x5a   : > { %377 = vperm.xlu1 %1011, %v914_v26  }
  0x5b   : > { %372 = vperm.xlu0 %1010, %v913_v27  }
  0x61   : > { %397 = vperm.xlu2 %1012, %v918_v28  }
  0x62   : > { %392 = vperm.xlu1 %1011, %v917_v29  }
  0x63   : > { %387 = vperm.xlu0 %1010, %v916_v30  }
  0x69   : > { %439 = vperm.xlu2 %1012, %v921_v31  }
  0x6a   : > { %407 = vperm.xlu1 %1011, %v920_v32  }
  0x6b   : > { %402 = vperm.xlu0 %1010, %v919_v33  }
  0x71   : > { %454 = vperm.xlu2 %1012, %v924_v34   ;;  %v944_v34 = vld [vmem:[%s1163_s28 + $0x80] sm:$0xff] }
  0x72   : > { %449 = vperm.xlu1 %1011, %v923_v35  }
  0x73   : > { %444 = vperm.xlu0 %1010, %v922_v36   ;;  %v1264_v37 = vpop.permute.xlu2 %200 }
  0x79   : > { %469 = vperm.xlu2 %1012, %v927_v38  }
  0x7a   : > { %464 = vperm.xlu1 %1011, %v926_v39  }
  0x7b   : > { %459 = vperm.xlu0 %1010, %v925_v40   ;;  %v1269_v41 = vpop.permute.xlu2 %205 }
  0x7c   : > { %v224_v39 = vmul.f32 %v1285_v50, %v1269_v41 }
  0x81   : > { %510 = vperm.xlu2 %1012, %v930_v42  }
  0x82   : > { %505 = vperm.xlu1 %1011, %v929_v43   ;;  %v223_v43 = vmul.f32 %v1285_v50, %v1264_v37 }
  0x83   : > { %474 = vperm.xlu0 %1010, %v928_v44   ;;  %v240_v45 = vpop.permute.xlu2 %239 }
  0x84   : > { %v278_v51 = vmul.f32 %v1279_v48, %v240_v45 }
  0x89   : > { %525 = vperm.xlu2 %1012, %v933_v46  }
  0x8a   : > { %520 = vperm.xlu1 %1011, %v932_v47  }
  0x8b   : > { %515 = vperm.xlu0 %1010, %v931_v49   ;;  %v255_v52 = vpop.permute.xlu2 %254 }
  0x8c   : > { %v191_v53 = vpop.permute.xlu1 %190  ;;  %v281_v62 = vmul.f32 %v1279_v48, %v255_v52 }
  0x8d   : > { %v181_v54 = vpop.permute.xlu0 %180  ;;  %v221_v29 = vmul.f32 %v1285_v50, %v191_v53 }
  0x8e   : > { %v219_v55 = vmul.f32 %v1285_v50, %v181_v54 }
  0x90   : > { %v286_v58 = vadd.f32 %v278_v51, %v219_v55 }
  0x91   : > { %540 = vperm.xlu2 %1012, %v936_v56  }
  0x92   : > { %535 = vperm.xlu1 %1011, %v935_v57  }
  0x93   : > { %530 = vperm.xlu0 %1010, %v934_v59   ;;  %v270_v60 = vpop.permute.xlu2 %269 }
  0x94   : > { %v196_v61 = vpop.permute.xlu1 %195  ;;  %v284_v26 = vmul.f32 %v1279_v48, %v270_v60 }
  0x95   : > { %v222_v63 = vmul.f32 %v1285_v50, %v196_v61  ;;  %v186_v0 = vpop.permute.xlu0 %185  ;;  %v952_v61 = vld [vmem:[%s1163_s28 + $0x110] sm:$0xff] }
  0x96   : > { %v220_v32 = vmul.f32 %v1285_v50, %v186_v0 }
  0x97   : > { %v289_v3 = vadd.f32 %v281_v62, %v222_v63 }
  0x99   : > { %582 = vperm.xlu2 %1012, %v1178_v5  }
  0x9a   : > { %577 = vperm.xlu1 %1011, %v1169_v2   ;;  %v1015_v2 = vld [vmem:[%s1517_s1 + $0x2] ss:$0 sm:$0xff] }
  0x9b   : > { %572 = vperm.xlu0 %1010, %v1181_v6   ;;  %v311_v7 = vpop.permute.xlu2 %310 }
  0x9c   : > { %v216_v17 = vpop.permute.xlu1 %215 }
  0x9d   : > { %v211_v25 = vpop.permute.xlu0 %210  ;;  %v226_v52 = vmul.f32 %v1285_v50, %v216_v17 }
  0x9e   : > { %v225_v27 = vmul.f32 %v1285_v50, %v211_v25 }
  0xa0   : > { %v1299_v28 = vadd.f32 %v284_v26, %v225_v27 }
  0xa1   : > { %597 = vperm.xlu2 %1012, %v1191_v9  }
  0xa2   : > { %592 = vperm.xlu1 %1011, %v1175_v4   ;;  %v345_v4 = vmul.f32 %v1015_v2, %v311_v7 }
  0xa3   : > { %587 = vperm.xlu0 %1010, %v1166_v1   ;;  %v326_v5 = vpop.permute.xlu2 %325 }
  0xa4   : > { %v250_v6 = vpop.permute.xlu1 %249  ;;  %v348_v46 = vmul.f32 %v1015_v2, %v326_v5 }
  0xa5   : > { %v280_v30 = vmul.f32 %v1279_v48, %v250_v6  ;;  %v245_v31 = vpop.permute.xlu0 %244  ;;  %v960_v6 = vld [vmem:[%s1163_s28 + $0x81] sm:$0xff] }
  0xa6   : > { %v279_v33 = vmul.f32 %v1279_v48, %v245_v31 }
  0xa7   : > { %v288_v9 = vadd.f32 %v280_v30, %v221_v29 }
  0xa8   : > { %v287_v35 = vadd.f32 %v279_v33, %v220_v32 }
  0xa9   : > { %639 = vperm.xlu2 %1012, %v1202_v12  }
  0xaa   : > { %607 = vperm.xlu1 %1011, %v944_v34   ;;  %v353_v1 = vadd.f32 %v345_v4, %v287_v35 }
  0xab   : > { %602 = vperm.xlu0 %1010, %v1188_v8   ;;  %v341_v36 = vpop.permute.xlu2 %340 }
  0xac   : > { %v265_v38 = vpop.permute.xlu1 %264  ;;  %v351_v54 = vmul.f32 %v1015_v2, %v341_v36 }
  0xad   : > { %v283_v40 = vmul.f32 %v1279_v48, %v265_v38  ;;  %v260_v42 = vpop.permute.xlu0 %259 }
  0xae   : > { %v282_v44 = vmul.f32 %v1279_v48, %v260_v42 }
  0xaf   : > { %v291_v45 = vadd.f32 %v283_v40, %v224_v39 }
  0xb0   : > { %v290_v12 = vadd.f32 %v282_v44, %v223_v43 }
  0xb1   : > { %654 = vperm.xlu2 %1012, %v1214_v15  }
  0xb2   : > { %649 = vperm.xlu1 %1011, %v1196_v10   ;;  %v356_v8 = vadd.f32 %v348_v46, %v290_v12 }
  0xb3   : > { %644 = vperm.xlu0 %1010, %v1199_v11   ;;  %v383_v47 = vpop.permute.xlu2 %382  ;;  %v1016_v11 = vld [vmem:[%s1517_s1 + $0x3] ss:$0 sm:$0xff] }
  0xb4   : > { %v306_v41 = vpop.permute.xlu1 %305  ;;  %v413_v59 = vmul.f32 %v1016_v11, %v383_v47 }
  0xb5   : > { %v344_v49 = vmul.f32 %v1015_v2, %v306_v41  ;;  %v275_v51 = vpop.permute.xlu0 %274 }
  0xb6   : > { %v285_v37 = vmul.f32 %v1279_v48, %v275_v51 }
  0xb7   : > { %v352_v53 = vadd.f32 %v344_v49, %v286_v58 }
  0xb8   : > { %v293_v55 = vadd.f32 %v285_v37, %v226_v52 }
  0xb9   : > { %669 = vperm.xlu2 %1012, %v1224_v18  }
  0xba   : > { %664 = vperm.xlu1 %1011, %v1208_v13   ;;  %v359_v10 = vadd.f32 %v351_v54, %v293_v55 }
  0xbb   : > { %659 = vperm.xlu0 %1010, %v1211_v14   ;;  %v398_v15 = vpop.permute.xlu2 %397 }
  0xbc   : > { %v321_v56 = vpop.permute.xlu1 %320  ;;  %v416_v17 = vmul.f32 %v1016_v11, %v398_v15 }
  0xbd   : > { %v347_v50 = vmul.f32 %v1015_v2, %v321_v56  ;;  %v316_v57 = vpop.permute.xlu0 %315 }
  0xbe   : > { %v346_v48 = vmul.f32 %v1015_v2, %v316_v57 }
  0xbf   : > { %v355_v58 = vadd.f32 %v347_v50, %v289_v3 }
  0xc0   : > { %v354_v60 = vadd.f32 %v346_v48, %v288_v9 }
  0xc1   : > { %710 = vperm.xlu2 %1012, %v1235_v21  }
  0xc2   : > { %705 = vperm.xlu1 %1011, %v1220_v16   ;;  %v421_v13 = vadd.f32 %v413_v59, %v354_v60  ;;  %v1341_v16 = vld [vmem:[%s1517_s1 + $0x4] ss:$0 sm:$0xff] }
  0xc3   : > { %674 = vperm.xlu0 %1010, %v952_v61   ;;  %v440_v14 = vpop.permute.xlu2 %439 }
  0xc4   : > { %v336_v18 = vpop.permute.xlu1 %335  ;;  %v478_v29 = vmul.f32 %v1341_v16, %v440_v14 }
  0xc5   : > { %v350_v62 = vmul.f32 %v1015_v2, %v336_v18  ;;  %v331_v63 = vpop.permute.xlu0 %330 }
  0xc6   : > { %v349_v0 = vmul.f32 %v1015_v2, %v331_v63 }
  0xc7   : > { %v358_v7 = vadd.f32 %v350_v62, %v1299_v28  ;;  %v1381_v62 = vld [vmem:[%s1517_s1 + $0x5] ss:$0 sm:$0xff] }
  0xc8   : > { %v357_v25 = vadd.f32 %v349_v0, %v291_v45  ;;  %v1386_v0 = vld [vmem:[%s1517_s1 + $0x6] ss:$0 sm:$0xff] }
  0xc9   : > { %725 = vperm.xlu2 %1012, %v1247_v24  }
  0xca   : > { %720 = vperm.xlu1 %1011, %v1229_v19   ;;  %v424_v3 = vadd.f32 %v416_v17, %v357_v25 }
  0xcb   : > { %715 = vperm.xlu0 %1010, %v1232_v20   ;;  %v455_v21 = vpop.permute.xlu2 %454 }
  0xcc   : > { %v378_v26 = vpop.permute.xlu1 %377  ;;  %v481_v34 = vmul.f32 %v1341_v16, %v455_v21  ;;  %v1394_v21 = vld [vmem:[%s1517_s1 + $0x7] ss:$0 sm:$0xff] }
  0xcd   : > { %v412_v27 = vmul.f32 %v1016_v11, %v378_v26  ;;  %v373_v2 = vpop.permute.xlu0 %372 }
  0xce   : > { %v411_v5 = vmul.f32 %v1016_v11, %v373_v2 }
  0xcf   : > { %v420_v28 = vadd.f32 %v412_v27, %v353_v1  ;;  %v1399_v27 = vld [vmem:[%s1517_s1 + $0x8] ss:$0 sm:$0xff] }
  0xd0   : > { %v419_v24 = vadd.f32 %v411_v5, %v352_v53 }
  0xd1   : > { %740 = vperm.xlu2 %1012, %v960_v6  }
  0xd2   : > { %735 = vperm.xlu1 %1011, %v1241_v22   ;;  %v1346_v19 = vadd.f32 %v478_v29, %v419_v24 }
  0xd3   : > { %730 = vperm.xlu0 %1010, %v1244_v23   ;;  %v470_v20 = vpop.permute.xlu2 %469 }
  0xd4   : > { %v393_v30 = vpop.permute.xlu1 %392  ;;  %v484_v23 = vmul.f32 %v1341_v16, %v470_v20  ;;  %v1406_v20 = vld [vmem:[%s1518_s2] ss:$0 sm:$0xff] }
  0xd5   : > { %v415_v31 = vmul.f32 %v1016_v11, %v393_v30  ;;  %v388_v32 = vpop.permute.xlu0 %387 }
  0xd6   : > { %v414_v33 = vmul.f32 %v1016_v11, %v388_v32 }
  0xd7   : > { %v423_v9 = vadd.f32 %v415_v31, %v356_v8 }
  0xd8   : > { %v422_v4 = vadd.f32 %v414_v33, %v355_v58 }
  0xda   : > { %v1350_v35 = vadd.f32 %v481_v34, %v422_v4 }
  0xdb   : > { %v511_v1 = vpop.permute.xlu2 %510 }
  0xdc   : > { %v408_v36 = vpop.permute.xlu1 %407  ;;  %v545_v17 = vmul.f32 %v1381_v62, %v511_v1 }
  0xdd   : > { %v418_v38 = vmul.f32 %v1016_v11, %v408_v36  ;;  %v403_v39 = vpop.permute.xlu0 %402 }
  0xde   : > { %v417_v22 = vmul.f32 %v1016_v11, %v403_v39 }
  0xdf   : > { %v1352_v40 = vadd.f32 %v418_v38, %v359_v10 }
  0xe0   : > { %v425_v42 = vadd.f32 %v417_v22, %v358_v7 }
  0xe2   : > { %v1355_v43 = vadd.f32 %v484_v23, %v425_v42 }
  0xe3   : > { %v526_v44 = vpop.permute.xlu2 %525 }
  0xe4   : > { %v450_v45 = vpop.permute.xlu1 %449  ;;  %v548_v31 = vmul.f32 %v1381_v62, %v526_v44 }
  0xe5   : > { %v480_v46 = vmul.f32 %v1341_v16, %v450_v45  ;;  %v445_v12 = vpop.permute.xlu0 %444 }
  0xe7   : > { %v1358_v8 = vadd.f32 %v480_v46, %v421_v13  ;;  %v479_v13 = vmul.f32 %v1341_v16, %v445_v12 }
  0xe9   : > { %v487_v63 = vadd.f32 %v479_v13, %v420_v28 }
  0xeb   : > { %v541_v47 = vpop.permute.xlu2 %540  ;;  %v553_v26 = vadd.f32 %v545_v17, %v487_v63 }
  0xec   : > { %v465_v41 = vpop.permute.xlu1 %464 }
  0xed   : > { %v483_v49 = vmul.f32 %v1341_v16, %v465_v41  ;;  %v460_v51 = vpop.permute.xlu0 %459 }
  0xef   : > { %v1361_v52 = vadd.f32 %v483_v49, %v424_v3  ;;  %v482_v3 = vmul.f32 %v1341_v16, %v460_v51  ;;  %v551_v51 = vmul.f32 %v1381_v62, %v541_v47 }
  0xf1   : > { %v490_v29 = vadd.f32 %v482_v3, %v423_v9 }
  0xf3   : > { %v1363_v37 = vpop.permute.xlu2 %582  ;;  %v556_v9 = vadd.f32 %v548_v31, %v490_v29 }
  0xf4   : > { %v506_v53 = vpop.permute.xlu1 %505 }
  0xf5   : > { %v475_v54 = vpop.permute.xlu0 %474  ;;  %v544_v34 = vmul.f32 %v1381_v62, %v506_v53 }
  0xf6   : > { %v485_v1 = vmul.f32 %v1341_v16, %v475_v54 }
  0xf7   : > { %v552_v45 = vadd.f32 %v544_v34, %v1346_v19 }
  0xf8   : > { %v493_v46 = vadd.f32 %v485_v1, %v1352_v40 }
  0xfa   : > { %v559_v40 = vadd.f32 %v551_v51, %v493_v46 }
  0xfb   : > { %v1365_v55 = vpop.permute.xlu2 %597 }
  0xfc   : > { %v521_v10 = vpop.permute.xlu1 %520 }
  0xfd   : > { %v516_v11 = vpop.permute.xlu0 %515 }
 0x103   : > { %v640_v15 = vpop.permute.xlu2 %639 }
 0x104   : > { %v1367_v56 = vpop.permute.xlu1 %535  ;;  %v678_v19 = vmul.f32 %v1394_v21, %v640_v15 }
 0x105   : > { %v1369_v50 = vpop.permute.xlu0 %530 }
 0x10b   : > { %v1371_v48 = vpop.permute.xlu2 %654 }
 0x10c   : > { %v578_v57 = vpop.permute.xlu1 %577 }
 0x10d   : > { %v573_v58 = vpop.permute.xlu0 %572  ;;  %v612_v25 = vmul.f32 %v1386_v0, %v578_v57 }
 0x10e   : > { %v611_v39 = vmul.f32 %v1386_v0, %v573_v58  ;;  %v547_v58 = vmul.f32 %v1381_v62, %v521_v10 }
 0x10f   : > { %v620_v28 = vadd.f32 %v612_v25, %v553_v26 }
 0x110   : > { %v619_v49 = vadd.f32 %v611_v39, %v552_v45 }
 0x113   : > { %v1373_v61 = vpop.permute.xlu2 %669 }
 0x114   : > { %v593_v59 = vpop.permute.xlu1 %592 }
 0x115   : > { %v588_v60 = vpop.permute.xlu0 %587  ;;  %v615_v32 = vmul.f32 %v1386_v0, %v593_v59  ;;  %v546_v59 = vmul.f32 %v1381_v62, %v516_v11  ;;  %v555_v11 = vadd.f32 %v547_v58, %v1350_v35 }
 0x116   : > { %v614_v17 = vmul.f32 %v1386_v0, %v588_v60 }
 0x117   : > { %v623_v23 = vadd.f32 %v615_v32, %v556_v9  ;;  %v613_v32 = vmul.f32 %v1386_v0, %v1363_v37  ;;  %v549_v9 = vmul.f32 %v1381_v62, %v1369_v50 }
 0x11b   : > { %v711_v7 = vpop.permute.xlu2 %710 }
 0x11c   : > { %v608_v14 = vpop.permute.xlu1 %607  ;;  %v745_v24 = vmul.f32 %v1399_v27, %v711_v7 }
 0x11d   : > { %v1376_v18 = vpop.permute.xlu0 %602  ;;  %v618_v53 = vmul.f32 %v1386_v0, %v608_v14  ;;  %v686_v14 = vadd.f32 %v678_v19, %v619_v49 }
 0x11f   : > { %v626_v26 = vadd.f32 %v618_v53, %v559_v40 }
 0x123   : > { %v726_v4 = vpop.permute.xlu2 %725 }
 0x124   : > { %v650_v2 = vpop.permute.xlu1 %649  ;;  %v748_v16 = vmul.f32 %v1399_v27, %v726_v4  ;;  %v681_v4 = vmul.f32 %v1394_v21, %v1371_v48 }
 0x125   : > { %v645_v5 = vpop.permute.xlu0 %644  ;;  %v680_v35 = vmul.f32 %v1394_v21, %v650_v2  ;;  %v617_v2 = vmul.f32 %v1386_v0, %v1376_v18 }
 0x126   : > { %v679_v6 = vmul.f32 %v1394_v21, %v645_v5 }
 0x128   : > { %v687_v30 = vadd.f32 %v679_v6, %v620_v28  ;;  %v554_v6 = vadd.f32 %v546_v59, %v1358_v8  ;;  %v550_v8 = vmul.f32 %v1381_v62, %v1367_v56 }
 0x12a   : > { %v753_v33 = vadd.f32 %v745_v24, %v687_v30  ;;  %v622_v30 = vadd.f32 %v614_v17, %v555_v11  ;;  %v558_v50 = vadd.f32 %v550_v8, %v1355_v43 }
 0x12b   : > { %v741_v47 = vpop.permute.xlu2 %740 }
 0x12c   : > { %v765_v36 = vadd.f32 %v1406_v20, %v753_v33  ;;  %v1413_v38 = vpop.permute.xlu1 %664  ;;  %v751_v60 = vmul.f32 %v1399_v27, %v741_v47  ;;  %v625_v51 = vadd.f32 %v617_v2, %v558_v50 }
 0x12d   : > { %v660_v22 = vpop.permute.xlu0 %659  ;;  %v683_v58 = vmul.f32 %v1394_v21, %v1413_v38 }
 0x12e   : > { %v773_v42 = vadd.f32 3.0, %v765_v36  ;;  %v682_v44 = vmul.f32 %v1394_v21, %v660_v22 }
 0x130   : > { %v781_v12 = vmax.f32 %v773_v42, 0.0  ;;  %v690_v41 = vadd.f32 %v682_v44, %v623_v23  ;;  %v689_v42 = vadd.f32 %v681_v4, %v622_v30 }
 0x132   : > { %v789_v54 = vmin.f32 %v781_v12, 6.0  ;;  %v756_v57 = vadd.f32 %v748_v16, %v690_v41  ;;  %v557_v41 = vadd.f32 %v549_v9, %v1361_v52  ;;  %v684_v52 = vmul.f32 %v1394_v21, %v1373_v61 }
 0x134   : > { %v797_v13 = vmul.f32 0.16666667, %v789_v54  ;;  %v768_v63 = vadd.f32 %v1406_v20, %v756_v57  ;;  %v706_v7 = vpop.permute.xlu1 %705  ;;  %v616_v57 = vmul.f32 %v1386_v0, %v1365_v55  ;;  %v692_v55 = vadd.f32 %v684_v52, %v625_v51 }
 0x135   : > { %v744_v25 = vmul.f32 %v1399_v27, %v706_v7  ;;  %v675_v3 = vpop.permute.xlu0 %674 }
 0x136   : > { %v805_v5 = vmul.f32 %v797_v13, %v765_v36  ;;  %v776_v10 = vadd.f32 3.0, %v768_v63  ;;  %v685_v15 = vmul.f32 %v1394_v21, %v675_v3  ;;  %v621_v36 = vadd.f32 %v613_v32, %v554_v6 }
 0x137   : > { %v752_v28 = vadd.f32 %v744_v25, %v686_v14  ;;  %v624_v13 = vadd.f32 %v616_v57, %v557_v41 }
 0x138   : > { %814 = vst.msk [vmem:[%s1434_s6 + $0x8] sm:$0xff] %vm812_vm0, %v805_v5  ;;  %v784_v29 = vmax.f32 %v776_v10, 0.0  ;;  %v693_v24 = vadd.f32 %v685_v15, %v626_v26  ;;  %v688_v45 = vadd.f32 %v680_v35, %v621_v36 }
 0x139   : > { %v764_v31 = vadd.f32 %v1406_v20, %v752_v28  ;;  %v691_v14 = vadd.f32 %v683_v58, %v624_v13 }
 0x13a   : > { %v792_v33 = vmin.f32 %v784_v29, 6.0  ;;  %v759_v34 = vadd.f32 %v751_v60, %v693_v24 }
 0x13b   : > { %v772_v1 = vadd.f32 3.0, %v764_v31 }
 0x13c   : > { %v800_v39 = vmul.f32 0.16666667, %v792_v33  ;;  %v771_v22 = vadd.f32 %v1406_v20, %v759_v34  ;;  %v721_v37 = vpop.permute.xlu1 %720 }
 0x13d   : > { %v780_v23 = vmax.f32 %v772_v1, 0.0  ;;  %v747_v56 = vmul.f32 %v1399_v27, %v721_v37  ;;  %v716_v44 = vpop.permute.xlu0 %715 }
 0x13e   : > { %v808_v48 = vmul.f32 %v800_v39, %v768_v63  ;;  %v779_v46 = vadd.f32 3.0, %v771_v22  ;;  %v746_v16 = vmul.f32 %v1399_v27, %v716_v44 }
 0x13f   : > { %v788_v62 = vmin.f32 %v780_v23, 6.0  ;;  %v755_v12 = vadd.f32 %v747_v56, %v689_v42 }
 0x140   : > { %817 = vst.msk [vmem:[%s1434_s6 + $0x20] sm:$0xff] %vm812_vm0, %v808_v48  ;;  %v787_v49 = vmax.f32 %v779_v46, 0.0  ;;  %v754_v18 = vadd.f32 %v746_v16, %v688_v45 }
 0x141   : > { %v796_v53 = vmul.f32 0.16666667, %v788_v62  ;;  %v767_v54 = vadd.f32 %v1406_v20, %v755_v12 }
 0x142   : > { %v795_v43 = vmin.f32 %v787_v49, 6.0  ;;  %v766_v19 = vadd.f32 %v1406_v20, %v754_v18 }
 0x143   : > { %v804_v59 = vmul.f32 %v796_v53, %v764_v31  ;;  %v775_v40 = vadd.f32 3.0, %v767_v54 }
 0x144   : > { %v803_v63 = vmul.f32 0.16666667, %v795_v43  ;;  %v774_v7 = vadd.f32 3.0, %v766_v19  ;;  %v736_v17 = vpop.permute.xlu1 %735 }
 0x145   : > { %813 = vst.msk [vmem:[%s1434_s6] sm:$0xff] %vm812_vm0, %v804_v59  ;;  %v783_v47 = vmax.f32 %v775_v40, 0.0  ;;  %v750_v0 = vmul.f32 %v1399_v27, %v736_v17  ;;  %v731_v38 = vpop.permute.xlu0 %730 }
 0x146   : > { %v811_v25 = vmul.f32 %v803_v63, %v771_v22  ;;  %v782_v3 = vmax.f32 %v774_v7, 0.0  ;;  %v749_v61 = vmul.f32 %v1399_v27, %v731_v38 }
 0x147   : > { %v791_v21 = vmin.f32 %v783_v47, 6.0  ;;  %v758_v26 = vadd.f32 %v750_v0, %v692_v55 }
 0x148   : > { %820 = vst.msk [vmem:[%s1434_s6 + $0x38] sm:$0xff] %vm812_vm0, %v811_v25  ;;  %v790_v5 = vmin.f32 %v782_v3, 6.0  ;;  %v757_v10 = vadd.f32 %v749_v61, %v691_v14 }
 0x149   : > { %v799_v15 = vmul.f32 0.16666667, %v791_v21  ;;  %v770_v11 = vadd.f32 %v1406_v20, %v758_v26 }
 0x14a   : > { %v798_v28 = vmul.f32 0.16666667, %v790_v5  ;;  %v769_v6 = vadd.f32 %v1406_v20, %v757_v10 }
 0x14b   : > { %v807_v60 = vmul.f32 %v799_v15, %v767_v54  ;;  %v778_v29 = vadd.f32 3.0, %v770_v11 }
 0x14c   : > { %v806_v24 = vmul.f32 %v798_v28, %v766_v19  ;;  %v777_v30 = vadd.f32 3.0, %v769_v6 }
 0x14d   : > { %816 = vst.msk [vmem:[%s1434_s6 + $0x18] sm:$0xff] %vm812_vm0, %v807_v60  ;;  %v786_v27 = vmax.f32 %v778_v29, 0.0 }
 0x14e   : > { %815 = vst.msk [vmem:[%s1434_s6 + $0x10] sm:$0xff] %vm812_vm0, %v806_v24  ;;  %v785_v31 = vmax.f32 %v777_v30, 0.0 }
 0x14f   : > { %v794_v32 = vmin.f32 %v786_v27, 6.0 }
 0x150   : > { %v793_v20 = vmin.f32 %v785_v31, 6.0 }
 0x151   : > { %v802_v35 = vmul.f32 0.16666667, %v794_v32 }
 0x152   : > { %v801_v33 = vmul.f32 0.16666667, %v793_v20 }
 0x153   : > { %v810_v34 = vmul.f32 %v802_v35, %v770_v11 }
 0x154   : > { %v809_v8 = vmul.f32 %v801_v33, %v769_v6 }
 0x155   : > { %819 = vst.msk [vmem:[%s1434_s6 + $0x30] sm:$0xff] %vm812_vm0, %v810_v34 }
 0x156   : > { %818 = vst.msk [vmem:[%s1434_s6 + $0x28] sm:$0xff] %vm812_vm0, %v809_v8 }
 0x157   : > { %1050 = shalt.err (!%p1047_p3)
}
 0x158   : > { %s1088_s29 = smov 128   ;;  %s1089_s30 = smov 8  }
 0x159   : > { %968 = dma.vmem_to_hbm [thread:$0]  (%p1148_p5), %s835_s16, 1024, %s837_s11, %s822_s17, %s1088_s29, %s1088_s29, %s1089_s30  }
 0x15a PF: > { %p974_p4 = scmp.ge.s32.totalorder %s1085_s15, 2  ;;  %s851_s4 = sand.u32 1, %s1073_s12  }
 0x15b   : > { %s852_s5 = scalar_lea.sflag [#allocation3], %s851_s4 }
 0x15c   : > { %p971_p7 = pnand %p974_p4, %p1152_p6 }
 0x15e   : > { %p972_p8 = pneg %p971_p7 }
 0x160   : > { %1068 = dma.done.wait (%p972_p8), %s852_s5, 1024  }
 0x161   : > { %1070 = vsyncadd (%p972_p8), %s852_s5, 4294966272  ;;  %p13_p9 = scmp.ge.s32.totalorder %s1135_s18, 4   ;;  %s1522_s12 = smov %s1077_s13 }
 0x162   : > { %s1523_s13 = smov %s1081_s14  ;;  %s1524_s14 = smov %s1146_s21 }
 0x163   : > { %s1525_s15 = smov %s1135_s18  ;;  %15 = sbr.rel (!%p13_p9) target bundleno = 3 (0x3), region = 72 }
 0x168   :  { %858 = vsyncpa [#allocation3], 1 }
 0x169   :  { %860 = vsyncpa [#allocation3 + $0x1], 1 }

</bundles_post_ra>
